<compile_context>
chip_gen: v5e
topology: v5e:2x2
jax: 0.10.0
libtpu: 0.0.40
codegen_flags: <defaults>
</compile_context>

<pallas_src>
import functools

import jax
import jax.numpy as jnp
import numpy as np
from jax.experimental import pallas as pl
from jax.experimental.pallas import tpu as pltpu


def _layernorm_kernel(alpha_ref, bias_ref, x_ref, o_ref, *, eps, n_feat):
    # alpha_ref / bias_ref are scalar-prefetch refs in SMEM, shape (1,).
    x = x_ref[...].astype(jnp.float32)                     # (tile_rows, H)
    mean = jnp.mean(x, axis=-1, keepdims=True)             # (tile_rows, 1)
    diff = x - mean                                        # only for the reduce
    # torch.std default: unbiased estimator (divide by N - 1)
    var = jnp.sum(diff * diff, axis=-1, keepdims=True) * (1.0 / (n_feat - 1))
    d = jnp.sqrt(var) + eps                                # (tile_rows, 1)
    # Per-row reciprocal on the EUP slot; one Newton step restores full f32
    # precision (keeps numerics within 1e-5 of the exact divide).
    inv = pl.reciprocal(d, approx=True)
    inv = inv * (2.0 - d * inv)
    scale = alpha_ref[0] * inv                             # (tile_rows, 1)
    offset = bias_ref[0] - scale * mean                    # (tile_rows, 1)
    # Single fused multiply-add per element on the output path.
    o_ref[...] = (x * scale + offset).astype(o_ref.dtype)


def _choose_tile_rows(rows, h, in_itemsize, out_itemsize):
    """Pick the largest row tile that fits the pipelined VMEM budget."""
    # Sublane alignment: 8 rows for f32, 16 for bf16, 32 for int8/fp8.
    row_align = max(8, 32 // in_itemsize)
    # Resident bytes per row: double-buffered in + out tiles, plus ~2 f32
    # working copies of the tile inside the body (x upcast, diff).
    per_row = h * (2 * in_itemsize + 2 * out_itemsize + 8)
    budget = 24 * 1024 * 1024          # safe on v7x (64 MiB VMEM) and v5e/v6e
    cap = max(row_align, (budget // per_row) // row_align * row_align)
    cap = min(cap, 1024)               # ~85%+ of HBM roofline well before this
    rows_aligned = pl.cdiv(rows, row_align) * row_align
    tile = min(cap, rows_aligned)
    # Prefer a grid of length >= 2 so the parallel row axis shards across the
    # two TensorCores on v7x (costs nothing on single-TC v5e/v6e).
    if tile == rows_aligned and rows_aligned >= 2 * row_align:
        tile = pl.cdiv(rows_aligned // 2, row_align) * row_align
    return tile


def layer_normalizing(x, alpha, bias, eps=1e-6):
    """Pallas implementation of LayerNormalizing.forward."""
    orig_shape = x.shape
    h = orig_shape[-1]
    if h < 2:
        raise ValueError("LayerNormalizing requires feature dim >= 2 "
                         "(torch unbiased std is undefined for H == 1).")
    x2 = x.reshape(-1, h)
    rows = x2.shape[0]

    in_itemsize = jnp.dtype(x.dtype).itemsize
    out_itemsize = in_itemsize  # I/O stays in the input dtype
    tile_rows = _choose_tile_rows(rows, h, in_itemsize, out_itemsize)

    n_blocks = pl.cdiv(rows, tile_rows)
    padded_rows = n_blocks * tile_rows
    if padded_rows != rows:
        # Zero rows normalize to finite values and are sliced off afterwards.
        x2 = jnp.pad(x2, ((0, padded_rows - rows), (0, 0)))

    # Explicit scoped-VMEM limit sized to the actual pipelined footprint.
    footprint = tile_rows * h * (2 * in_itemsize + 2 * out_itemsize + 8)
    vmem_limit = int(min(40 << 20, max(16 << 20, footprint + (4 << 20))))

    alpha32 = jnp.asarray(alpha, jnp.float32).reshape(1)
    bias32 = jnp.asarray(bias, jnp.float32).reshape(1)

    kernel = functools.partial(_layernorm_kernel, eps=float(eps), n_feat=h)

    cost = pl.CostEstimate(
        flops=6 * padded_rows * h,
        transcendentals=2 * padded_rows,
        bytes_accessed=padded_rows * h * (in_itemsize + out_itemsize),
    )

    out2 = pl.pallas_call(
        kernel,
        out_shape=jax.ShapeDtypeStruct((padded_rows, h), x.dtype),
        grid_spec=pltpu.PrefetchScalarGridSpec(
            num_scalar_prefetch=2,          # alpha, bias -> SMEM
            grid=(n_blocks,),
            in_specs=[
                pl.BlockSpec((tile_rows, h), lambda i, a, b: (i, 0)),
            ],
            out_specs=pl.BlockSpec((tile_rows, h), lambda i, a, b: (i, 0)),
        ),
        compiler_params=pltpu.CompilerParams(
            dimension_semantics=("parallel",),
            vmem_limit_bytes=vmem_limit,
        ),
        cost_estimate=cost,
    )(alpha32, bias32, x2)

    if padded_rows != rows:
        out2 = out2[:rows]
    return out2.reshape(orig_shape)


def encoder_chains(x, src_mask, encoder_blocks, alpha, bias, eps=1e-6):
    """EncoderChains.forward: apply each (opaque) block, then the Pallas norm.

    `encoder_blocks` is a sequence of JAX callables block(x, src_mask) -> x.
    The blocks themselves are externally injected nn.Modules in the original
    code, so they are not translated here.
    """
    for block in encoder_blocks:
        x = block(x, src_mask)
    return layer_normalizing(x, alpha, bias, eps=eps)


def _reference(x, alpha, bias, eps=1e-6):
    mean = jnp.mean(x, axis=-1, keepdims=True)
    std = jnp.std(x, axis=-1, keepdims=True, ddof=1)  # unbiased, like torch
    return alpha * (x - mean) / (std + eps) + bias


if __name__ == "__main__":
    key = jax.random.PRNGKey(0)
    # Forward implies (..., hidden): use (batch=2, seq=8, hidden=32).
    x = jax.random.normal(key, (2, 8, 32), dtype=jnp.float32)
    src_mask = jnp.ones((2, 1, 8, 8), dtype=jnp.float32)   # unused by the norm

    # Deterministic params, matching nn.Parameter(torch.ones(1)/zeros(1)).
    alpha = jnp.ones((1,), dtype=jnp.float32)
    bias = jnp.zeros((1,), dtype=jnp.float32)

    # No encoder blocks supplied (they are external modules in the original).
    out = encoder_chains(x, src_mask, encoder_blocks=(), alpha=alpha,
                         bias=bias, eps=1e-6)
    out = jax.block_until_ready(out)

    ref = _reference(x, alpha, bias, eps=1e-6)
    np.testing.assert_allclose(np.asarray(out), np.asarray(ref),
                               rtol=1e-5, atol=1e-5)
    print("KERNEL_OK")
</pallas_src>

<mosaic_0001>
module attributes {stable_mosaic.version = 11 : i64} {
  func.func @_layernorm_kernel(%arg0: i32, %arg1: memref<1xf32, #tpu.memory_space<smem>>, %arg2: memref<1xf32, #tpu.memory_space<smem>>, %arg3: memref<8x32xf32, #tpu.memory_space<vmem>>, %arg4: memref<8x32xf32, #tpu.memory_space<vmem>>) attributes {dimension_semantics = [#tpu.dimension_semantics<parallel>], iteration_bounds = array<i64: 2>, scalar_prefetch = 2 : i64, scratch_operands = 0 : i64, tpu.core_type = #tpu.core_type<tc>, window_params = [{transform_indices = @transform_0, window_bounds = array<i64: 8, 32>}, {transform_indices = @transform_1, window_bounds = array<i64: 8, 32>}]} {
    %c0 = arith.constant 0 : index
    %c0_0 = arith.constant 0 : index
    %0 = vector.load %arg3[%c0, %c0_0] : memref<8x32xf32, #tpu.memory_space<vmem>>, vector<8x32xf32>
    %cst = arith.constant dense<0.000000e+00> : vector<8xf32>
    %1 = vector.multi_reduction <add>, %0, %cst [1] : vector<8x32xf32> to vector<8xf32>
    %2 = vector.shape_cast %1 : vector<8xf32> to vector<8x1xf32>
    %cst_1 = arith.constant 3.200000e+01 : f32
    %3 = vector.broadcast %cst_1 : f32 to vector<8x1xf32>
    %4 = arith.divf %2, %3 : vector<8x1xf32>
    %5 = vector.broadcast %4 : vector<8x1xf32> to vector<8x32xf32>
    %6 = arith.subf %0, %5 : vector<8x32xf32>
    %7 = arith.mulf %6, %6 : vector<8x32xf32>
    %cst_2 = arith.constant dense<0.000000e+00> : vector<8xf32>
    %8 = vector.multi_reduction <add>, %7, %cst_2 [1] : vector<8x32xf32> to vector<8xf32>
    %9 = vector.shape_cast %8 : vector<8xf32> to vector<8x1xf32>
    %cst_3 = arith.constant 0.0322580636 : f32
    %10 = vector.broadcast %cst_3 : f32 to vector<8x1xf32>
    %11 = arith.mulf %9, %10 : vector<8x1xf32>
    %12 = math.sqrt %11 : vector<8x1xf32>
    %cst_4 = arith.constant 9.99999997E-7 : f32
    %13 = vector.broadcast %cst_4 : f32 to vector<8x1xf32>
    %14 = arith.addf %12, %13 : vector<8x1xf32>
    %15 = tpu.reciprocal %14 {approx = true} : vector<8x1xf32> -> vector<8x1xf32>
    %16 = arith.mulf %14, %15 : vector<8x1xf32>
    %cst_5 = arith.constant 2.000000e+00 : f32
    %17 = vector.broadcast %cst_5 : f32 to vector<8x1xf32>
    %18 = arith.subf %17, %16 : vector<8x1xf32>
    %19 = arith.mulf %15, %18 : vector<8x1xf32>
    %c0_6 = arith.constant 0 : index
    %20 = memref.load %arg1[%c0_6] : memref<1xf32, #tpu.memory_space<smem>>
    %21 = vector.broadcast %20 : f32 to vector<8x1xf32>
    %22 = arith.mulf %21, %19 : vector<8x1xf32>
    %c0_7 = arith.constant 0 : index
    %23 = memref.load %arg2[%c0_7] : memref<1xf32, #tpu.memory_space<smem>>
    %24 = arith.mulf %22, %4 : vector<8x1xf32>
    %25 = vector.broadcast %23 : f32 to vector<8x1xf32>
    %26 = arith.subf %25, %24 : vector<8x1xf32>
    %27 = vector.broadcast %22 : vector<8x1xf32> to vector<8x32xf32>
    %28 = arith.mulf %0, %27 : vector<8x32xf32>
    %29 = vector.broadcast %26 : vector<8x1xf32> to vector<8x32xf32>
    %30 = arith.addf %28, %29 : vector<8x32xf32>
    %c0_8 = arith.constant 0 : index
    %c0_9 = arith.constant 0 : index
    %31 = vector.load %arg4[%c0_8, %c0_9] : memref<8x32xf32, #tpu.memory_space<vmem>>, vector<8x32xf32>
    tpu.vector_store %arg4[%c0_8, %c0_9], %30 {strides = array<i32>} : memref<8x32xf32, #tpu.memory_space<vmem>>, vector<8x32xf32>,
    return
  }
  func.func @transform_0(%arg0: i32, %arg1: memref<1xf32, #tpu.memory_space<smem>>, %arg2: memref<1xf32, #tpu.memory_space<smem>>) -> (i32, i32) {
    %c0_i32 = arith.constant 0 : i32
    %c0_i32_0 = arith.constant 0 : i32
    return %arg0, %c0_i32 : i32, i32
  }
  func.func @transform_1(%arg0: i32, %arg1: memref<1xf32, #tpu.memory_space<smem>>, %arg2: memref<1xf32, #tpu.memory_space<smem>>) -> (i32, i32) {
    %c0_i32 = arith.constant 0 : i32
    %c0_i32_0 = arith.constant 0 : i32
    return %arg0, %c0_i32 : i32, i32
  }
}

</mosaic_0001>

<bundles_post_ra>
// kernel: tpu_custom_call.1
= control target key start
LH: loop header
LB: loop body
LE: loop exit
PB: predicated region body
PF: predicated region fallthrough
CT: control target
= control target key end

     0   :  { %s594_s0 = inlined_call_operand.<no memory space> [shape: f32[1], index: 0, kind: input, shape index: {}]   ;;  %s595_s1 = inlined_call_operand.<no memory space> [shape: f32[1], index: 1, kind: input, shape index: {}]   ;;  %s596_s2 = inlined_call_operand.hbm [shape: f32[16,32], index: 2, kind: input, shape index: {}]   ;;  %s597_s3 = inlined_call_operand.hbm [shape: f32[16,32], index: 3, kind: output, shape index: {}]  }
   0x1   :  { %8 = sst [smem:[#allocation3]] %s594_s0 }
   0x2   :  { %9 = sst [smem:[#allocation4]] %s595_s1 }
   0x3   :  { %10 = vsyncpa [#allocation6], 0 }
   0x4   :  { %12 = vsyncpa [#allocation6 + $0x1], 0 }
   0x5   :  { %13 = vsyncpa [#allocation7], 0 }
   0x6   :  { %15 = vsyncpa [#allocation7 + $0x1], 0  ;;  %s460_s16 = smov 0   ;;  %s462_s17 = smov 0  }
   0x7   :  { %s464_s18 = smov 0   ;;  %s466_s19 = smov 0  }
   0x8 LB: > { %s481_s0 = sadd.s32 4294967295, %s431_s19   ;;  %s270_s1 = sadd.s32 4294967294, %s431_s19   ;;  %s431_s19 = sphi %s466_s19, %s607_s19   ;;  %s427_s18 = sphi %s464_s18, %s606_s18   ;;  %s423_s17 = sphi %s462_s17, %s605_s17   ;;  %s419_s16 = sphi %s460_s16, %s604_s16  }
   0x9   : > { %s485_s20 = sadd.s32 1, %s431_s19   ;;  %s28_s21 = sadd.s32 1, %s427_s18 }
   0xa   : > { %s25_s22 = ssub.s32 %s431_s19, %s485_s20  ;;  %p35_p0 = scmp.ne.s32.totalorder %s427_s18, %s423_s17 }
   0xb   : > { %p26_p1 = scmp.eq.s32.totalorder %s25_s22, 0  ;;  %p36_p2 = scmp.eq.s32.totalorder %s431_s19, 0 }
   0xc   : > { %p41_p3 = scmp.ne.s32.totalorder %s423_s17, %s419_s16  ;;  %p42_p4 = scmp.eq.s32.totalorder %s481_s0, 0 }
   0xd   : > { %s497_s23 = scalar_select %p26_p1, %s427_s18, %s28_s21  }
   0xe   : > { %p499_p5 = por %p36_p2, %p35_p0  ;;  %p503_p6 = por %p42_p4, %p41_p3 }
   0xf   : > { %p65_p7 = scmp.eq.s32.totalorder %s481_s0, 1  ;;  %p71_p8 = scmp.eq.s32.totalorder %s270_s1, 1 }
  0x10   : > { %p294_p10 = scmp.lt.s32.totalorder %s431_s19, 2  ;;  %s91_s28 = sand.u32 1, %s427_s18  }
  0x11   : > { %p510_p11 = por %p65_p7, %p35_p0  ;;  %p514_p12 = por %p71_p8, %p41_p3 }
  0x12   : > { %s274_s29 = sshll.u32 %s431_s19, 3  ;;  %s273_s30 = sshll.u32 %s91_s28, 3 }
  0x13   : > { %s99_s6 = scalar_lea.hbm %s596_s2, %s274_s29  ;;  %s95_s8 = scalar_lea.vmem [#allocation5], %s273_s30 }
  0x14   : > { %s101_s7 = sshll.u32 %s99_s6, 4  ;;  %s103_s9 = sshll.u32 %s95_s8, 4  ;;  %s102_s7 = int_to_ptr.hbm [resolvable:$true] %s101_s7  ;;  %s104_s9 = int_to_ptr.vmem [resolvable:$true] %s103_s9 }
  0x15   : > { %p525_p13 = pnand %p294_p10, %p499_p5  ;;  %p275_p0 = scmp.ge.s32.totalorder %s431_s19, 1 }
  0x16   : > { %p108_p1 = scmp.lt.s32.totalorder %s431_s19, 3  ;;  %s92_s11 = scalar_lea.sflag [#allocation6], %s91_s28 }
  0x17   : > { %s335_s12 = sshra.s32 %s102_s7, 4  ;;  %p339_p3 = pneg %p525_p13  ;;  %s336_s12 = int_to_ptr.hbm [resolvable:$true] %s335_s12 }
  0x18   : > { %s337_s13 = scalar_lea.hbm %s336_s12, 8  ;;  %s342_s1 = scalar_lea.hbm %s596_s2, 16 }
  0x19   : > { %p338_p2 = scmp.ne.s32.totalorder %s336_s12, %s337_s13  ;;  %p343_p5 = scmp.lt.s32.totalorder %s336_s12, %s596_s2 }
  0x1a   : > { %p344_p8 = scmp.lt.s32.totalorder %s342_s1, %s337_s13 }
  0x1b   : > { %p340_p4 = pnand %p339_p3, %p338_p2 }
  0x1c   : > { %p345_p10 = por %p344_p8, %p343_p5 }
  0x1d   : > { %p341_p7 = pneg %p340_p4 }
  0x1f   : > { %p346_p9 = pnand %p345_p10, %p341_p7 }
  0x21   : > { %349 = shalt.err (!%p346_p9)
}
  0x22   : > { %289 = dma.hbm_to_vmem [thread:$0]  (!%p525_p13), %s102_s7, 128, %s104_s9, %s92_s11  }
  0x23   : > { %p109_p2 = pnand %p275_p0, %p108_p1 }
  0x24   : > { %s546_s24 = sand.u32 (!%p109_p2), 1, %s423_s17  }
  0x25   : > { %112 = sbr.rel (%p109_p2) target bundleno = 333 (0x14d), region = 24  ;;  %s276_s28 = sshll.u32 (!%p109_p2), %s546_s24, 3 }
  0x26   : > { %s115_s29 = scalar_lea.sflag (!%p109_p2), [#allocation6], %s546_s24  ;;  %s118_s30 = scalar_lea.vmem (!%p109_p2), [#allocation5], %s276_s28 }
  0x2a   : > { %410 = dma.done.wait (%p503_p6), %s115_s29, 128  }
  0x2b   : > { %412 = vsyncadd (%p503_p6), %s115_s29, 4294967168  ;;  %vm139_vm0 = vcmask 261120   ;;  %v138_v0 = vld [vmem:[%s118_s30] sm:$0xff]  ;;  %v433_v2 = vmov 32.0   ;;  %s174_s25 = sld [smem:[#allocation3]]  ;;  %s279_s5 = sshll.u32 %s481_s0, 3 }
  0x2c   : > { %v140_v1 = vsel %vm139_vm0, %v138_v0, 0.0  ;;  %329 = vrcp.f32 %v433_v2  ;;  %s177_s4 = sld [smem:[#allocation4]]  ;;  %s195_s8 = scalar_lea.hbm %s597_s3, %s279_s5 }
  0x2d   : > { %141 = vadd.xlane.f32.xlu0 %v140_v1  ;;  %s137_s9 = scalar_lea.vmem [#allocation8], %s276_s28  ;;  %s199_s11 = sshll.u32 %s195_s8, 4  ;;  %s200_s11 = int_to_ptr.hbm [resolvable:$true] %s199_s11 }
  0x2e   : > { %s197_s10 = sshll.u32 %s137_s9, 4  ;;  %s185_s0 = scalar_lea.sflag [#allocation7], %s546_s24  ;;  %s198_s10 = int_to_ptr.vmem [resolvable:$true] %s197_s10 }
  0x2f   : > { %s379_s12 = sshra.s32 %s200_s11, 4  ;;  %s385_s1 = scalar_lea.hbm %s597_s3, 16  ;;  %s380_s12 = int_to_ptr.hbm [resolvable:$true] %s379_s12 }
  0x30   : > { %s381_s13 = scalar_lea.hbm %s380_s12, 8  ;;  %p386_p0 = scmp.lt.s32.totalorder %s380_s12, %s597_s3 }
  0x31   : > { %v175_v30 = vstv %s174_s25  ;;  %p382_p6 = scmp.ne.s32.totalorder %s380_s12, %s381_s13  ;;  %p387_p1 = scmp.lt.s32.totalorder %s385_s1, %s381_s13 }
  0x32   : > { %v330_v3 = vpop.eup %329  ;;  %v179_v33 = vstv %s177_s4 }
  0x33   : > { %v144_v4 = vmul.f32 32.0, %v330_v3  ;;  %vm148_vm1 = vweird.f32 %v330_v3  ;;  %p383_p9 = pnand %p382_p6, %p510_p11  ;;  %p388_p3 = por %p387_p1, %p386_p0 }
  0x35   : > { %v145_v5 = vsub.f32 1.0, %v144_v4  ;;  %p384_p13 = pneg %p383_p9 }
  0x37   : > { %v146_v6 = vmul.f32 %v330_v3, %v145_v5  ;;  %p389_p4 = pnand %p388_p3, %p384_p13 }
  0x39   : > { %v147_v7 = vadd.f32 %v330_v3, %v146_v6 }
  0x3b   : > { %v149_v8 = vsel %vm148_vm1, %v330_v3, %v147_v7 }
  0xa0   : > { %v142_v9 = vpop.xlane.xlu0 %141 }
  0xa1   : > { %v150_v10 = vmul.f32 %v149_v8, %v142_v9 }
  0xa3   : > { %v151_v11 = vsub.f32 %v138_v0, %v150_v10 }
  0xa5   : > { %v152_v12 = vmul.f32 %v151_v11, %v151_v11 }
  0xa7   : > { %v153_v13 = vsel %vm139_vm0, %v152_v12, 0.0 }
  0xa8   : > { %154 = vadd.xlane.f32.xlu0 %v153_v13 }
 0x11b   : > { %v155_v14 = vpop.xlane.xlu0 %154 }
 0x11c   : > { %v156_v15 = vmul.f32 0.032258064, %v155_v14 }
 0x11e   : > { %331 = vrsqrt.f32 %v156_v15  ;;  %vm164_vm2 = vcmp.eq.f32.partialorder %v156_v15, inf  ;;  %v167_v23 = vand.u32 2147483648, %v156_v15  ;;  %vm166_vm3 = vcmp.eq.f32.partialorder %v156_v15, 0.0 }
 0x124   : > { %v332_v16 = vpop.eup %331 }
 0x125   : > { %v158_v17 = vmul.f32 %v332_v16, %v156_v15 }
 0x127   : > { %v159_v18 = vmul.f32 %v332_v16, %v158_v17 }
 0x129   : > { %v160_v19 = vmul.f32 0.5, %v159_v18 }
 0x12b   : > { %v161_v20 = vsub.f32 1.5, %v160_v19 }
 0x12d   : > { %v162_v21 = vmul.f32 %v332_v16, %v161_v20 }
 0x12f   : > { %v163_v22 = vmul.f32 %v162_v21, %v156_v15 }
 0x131   : > { %v165_v24 = vsel %vm164_vm2, %v156_v15, %v163_v22 }
 0x132   : > { %v168_v25 = vsel %vm166_vm3, %v167_v23, %v165_v24 }
 0x133   : > { %v169_v26 = vadd.f32 1e-06, %v168_v25 }
 0x135   : > { %333 = vrcp.f32 %v169_v26 }
 0x13b   : > { %v334_v27 = vpop.eup %333 }
 0x13c   : > { %v171_v28 = vmul.f32 %v334_v27, %v169_v26 }
 0x13e   : > { %v172_v29 = vsub.f32 2.0, %v171_v28 }
 0x140   : > { %v173_v31 = vmul.f32 %v334_v27, %v172_v29 }
 0x142   : > { %v176_v32 = vmul.f32 %v175_v30, %v173_v31 }
 0x144   : > { %v178_v34 = vmul.f32 %v176_v32, %v150_v10  ;;  %v181_v36 = vmul.f32 %v176_v32, %v138_v0 }
 0x146   : > { %v180_v35 = vsub.f32 %v179_v33, %v178_v34 }
 0x148   : > { %v182_v37 = vadd.f32 %v181_v36, %v180_v35 }
 0x14a   : > { %183 = vst.msk [vmem:[%s137_s9] sm:$0xff] %vm139_vm0, %v182_v37 }
 0x14b   : > { %392 = shalt.err (!%p389_p4)
}
 0x14c   : > { %284 = dma.vmem_to_hbm [thread:$0]  (%p510_p11), %s198_s10, 128, %s200_s11, %s185_s0  }
 0x14d PF: > { %s211_s24 = sand.u32 1, %s419_s16   ;;  %p603_p7 = scmp.ge.s32.totalorder %s431_s19, 2 }
 0x14e   : > { %s212_s28 = scalar_lea.sflag [#allocation7], %s211_s24 }
 0x14f   : > { %p291_p5 = pnand %p603_p7, %p514_p12 }
 0x151   : > { %p292_p8 = pneg %p291_p5 }
 0x153   : > { %414 = dma.done.wait (%p292_p8), %s212_s28, 128  }
 0x154   : > { %416 = vsyncadd (%p292_p8), %s212_s28, 4294967168  ;;  %p18_p10 = scmp.ge.s32.totalorder %s485_s20, 4   ;;  %s604_s16 = smov %s423_s17 }
 0x155   : > { %s605_s17 = smov %s427_s18  ;;  %s606_s18 = smov %s497_s23 }
 0x156   : > { %s607_s19 = smov %s485_s20  ;;  %20 = sbr.rel (!%p18_p10) target bundleno = 8 (0x8), region = 69 }
 0x15b   :  { %218 = vsyncpa [#allocation6], 1 }
 0x15c   :  { %220 = vsyncpa [#allocation6 + $0x1], 1 }
 0x15d   :  { %221 = vsyncpa [#allocation7], 1 }
 0x15e   :  { %223 = vsyncpa [#allocation7 + $0x1], 1 }

</bundles_post_ra>
